<compile_context>
chip_gen: v7x
topology: tpu7x:2x2x1
jax: 0.10.0
libtpu: 0.0.40
codegen_flags: <defaults>
</compile_context>

<pallas_src>
import functools

import numpy as np
import jax
import jax.numpy as jnp
from jax import lax
from jax.experimental import pallas as pl
from jax.experimental.pallas import tpu as pltpu


# ----------------------------- parameter setup ------------------------------
def _pascal_kernel_1d(ksize: int) -> np.ndarray:
    """Binomial (pascal) row of length `ksize`, unnormalized: e.g. [1, 2, 1]."""
    row = np.array([1.0], dtype=np.float64)
    for _ in range(ksize - 1):
        row = np.convolve(row, [1.0, 1.0])
    return row


def _pascal_kernel_2d(ksize: int) -> np.ndarray:
    """get_pascal_kernel_2d(ksize, norm=True)."""
    k1 = _pascal_kernel_1d(ksize)
    k2 = np.outer(k1, k1)
    return k2 / k2.sum()


def _conv_selection_matrix(weights: np.ndarray, in_len: int, stride: int,
                           pad: int) -> np.ndarray:
    """Matrix M with M[o, i] = weights[kk] where i = o*stride - pad + kk (zero pad)."""
    k = len(weights)
    out_len = (in_len + 2 * pad - k) // stride + 1
    m = np.zeros((out_len, in_len), dtype=np.float32)
    for o in range(out_len):
        for kk in range(k):
            i = o * stride - pad + kk
            if 0 <= i < in_len:
                m[o, i] = weights[kk]
    return m


# ------------------------------ sizing helpers -------------------------------
def _cdiv(a: int, b: int) -> int:
    return -(-a // b)


def _round_up(n: int, m: int) -> int:
    return _cdiv(n, m) * m


def _tile_bytes(shape, itemsize: int) -> int:
    """VMEM footprint of an array, including (8, 128) sublane/lane padding."""
    if len(shape) == 0:
        return itemsize
    if len(shape) == 1:
        return _round_up(int(shape[0]), 128) * itemsize
    lead = 1
    for d in shape[:-2]:
        lead *= int(d)
    return lead * _round_up(int(shape[-2]), 8) * _round_up(int(shape[-1]), 128) * itemsize


def _vmem_capacity_bytes() -> int:
    try:
        cap = getattr(pltpu.get_tpu_info(), "vmem_capacity_bytes", None)
        if cap:
            return int(cap)
    except Exception:
        pass
    return 64 << 20  # conservative fallback (v7x per-core VMEM)


def _pick_tb(bc: int, per_step_vmem, budget_bytes: int, max_tb: int = 256) -> int:
    """Largest plane count per grid step fitting the VMEM budget, preferring
    >= 2 (and even) grid steps so software pipelining overlaps and v7x's two
    TensorCores stay balanced."""
    cap = 1
    for t in range(1, min(bc, max_tb) + 1):
        if per_step_vmem(t) <= budget_bytes:
            cap = t
        else:
            break
    tb = max(1, min(cap, bc))
    if bc >= 2 and _cdiv(bc, tb) < 2:          # keep the pipeline busy / 2 cores fed
        tb = _cdiv(bc, 2)
    steps = _cdiv(bc, tb)
    if steps >= 3 and steps % 2 == 1:          # even step count when it is cheap
        tb_even = _cdiv(bc, steps + 1)
        if tb_even >= 1 and _cdiv(bc, tb_even) % 2 == 0:
            tb = tb_even
    return tb


# ------------------------------- Pallas kernel ------------------------------
def _maxblurpool_kernel(x_ref, r_ref, ct_ref, o_ref, *, pool, tb, hm, wm,
                        compute_dtype):
    x = x_ref[...]                                   # (TB, H, W)
    if x.dtype != jnp.dtype(compute_dtype):
        x = x.astype(compute_dtype)

    # ---- stride-1 / "valid" max pool ---------------------------------------
    if pool == 2:
        # Direct 4-way max: no full-size separable temporary (saves ~1 plane
        # of VMEM per TB; the extra VPU max is free, kernel is not VALU-bound).
        mp = jnp.maximum(
            jnp.maximum(x[:, 0:hm, 0:wm], x[:, 0:hm, 1:wm + 1]),
            jnp.maximum(x[:, 1:hm + 1, 0:wm], x[:, 1:hm + 1, 1:wm + 1]))
    else:
        mpx = x[:, :, 0:wm]                          # lane (W) direction first
        for dx in range(1, pool):
            mpx = jnp.maximum(mpx, x[:, :, dx:dx + wm])
        mp = mpx[:, 0:hm, :]                         # then sublane (H) direction
        for dy in range(1, pool):
            mp = jnp.maximum(mp, mpx[:, dy:dy + hm, :])
    # mp: (TB, hm, wm)

    # ---- pascal blur + zero pad + stride as two batched MXU contractions ----
    # out_b = R @ mp_b @ Ct, batched over TB (no per-plane Python unroll, no
    # in-kernel reshapes/transposes); accumulation in f32 on the MXU.
    ct_b = jnp.broadcast_to(ct_ref[...], (tb,) + tuple(ct_ref.shape))     # (TB, wm, OW)
    t = lax.dot_general(mp, ct_b, (((2,), (1,)), ((0,), (0,))),
                        preferred_element_type=jnp.float32)               # (TB, hm, OW)
    t = t.astype(compute_dtype)     # keep bf16 inputs on the fast bf16 MXU path
    r_b = jnp.broadcast_to(r_ref[...], (tb,) + tuple(r_ref.shape))        # (TB, OH, hm)
    out = lax.dot_general(r_b, t, (((2,), (1,)), ((0,), (0,))),
                          preferred_element_type=jnp.float32)             # (TB, OH, OW)

    # ---- single full-block store (no per-plane masked stores) ---------------
    o_ref[...] = out.astype(o_ref.dtype)


# --------------------------------- wrapper ----------------------------------
def max_blur_pool_2d(x, kernel_size: int = 3, stride: int = 2,
                     max_pool_size: int = 2, ceil_mode: bool = False):
    """Forward pass of MaxBlurPool2D. x: (B, C, H, W) -> (B, C, H//stride, W//stride)."""
    B, C, H, W = x.shape
    pool = int(max_pool_size)
    # ceil_mode only affects the max pool, and because that pool runs at
    # stride=1 its output size is identical under ceil/floor -> genuine no-op.
    del ceil_mode

    hm = H - pool + 1
    wm = W - pool + 1
    pad = (kernel_size - 1) // 2

    k1 = _pascal_kernel_1d(kernel_size)
    # Separable split of the normalized 2D pascal kernel:
    # row weights = k1 (along H), col weights = k1 / sum(outer(k1, k1)) (along W).
    row_w = k1
    col_w = k1 / (k1.sum() ** 2)

    r_mat = _conv_selection_matrix(row_w, hm, stride, pad)        # (OH, hm)
    c_mat = _conv_selection_matrix(col_w, wm, stride, pad)        # (OW, wm)
    ct_mat = np.ascontiguousarray(c_mat.T)                        # (wm, OW)
    oh, ow = r_mat.shape[0], c_mat.shape[0]

    # Keep the blur operators / compute dtype floating even for non-float
    # inputs (fractional pascal weights would otherwise truncate to 0).
    if jnp.issubdtype(x.dtype, jnp.floating):
        compute_dtype = x.dtype
    else:
        compute_dtype = jnp.float32
    isz = jnp.dtype(x.dtype).itemsize
    csz = jnp.dtype(compute_dtype).itemsize

    bc = B * C

    def per_step_vmem(tb):
        io = (2 * _tile_bytes((tb, H, W), isz)        # double-buffered input block
              + 2 * _tile_bytes((tb, oh, ow), isz)    # double-buffered output block
              + 2 * _tile_bytes((oh, hm), csz)        # R operator
              + 2 * _tile_bytes((wm, ow), csz))       # Ct operator
        tmp = (_tile_bytes((tb, H, W), csz)           # loaded / cast input
               + _tile_bytes((tb, hm, wm), csz)       # max-pool result
               + (_tile_bytes((tb, H, wm), csz) if pool > 2 else 0)
               + _tile_bytes((tb, wm, ow), csz)       # broadcast Ct
               + _tile_bytes((tb, oh, hm), csz)       # broadcast R
               + _tile_bytes((tb, hm, ow), 4)         # first contraction (f32)
               + _tile_bytes((tb, hm, ow), csz)       # cast-back copy
               + _tile_bytes((tb, oh, ow), 4))        # second contraction (f32)
        return io + tmp

    # Generation-aware VMEM policy: ~70% of physical VMEM as the scoped limit
    # (v7x 64 MiB/core -> ~44 MiB, v5e/v6e 128 MiB -> ~89 MiB); the TB picker
    # gets that minus headroom for compiler-internal scratch.  The tb choice
    # and the vmem limit are derived from the same per-step estimate.
    vmem_cap = _vmem_capacity_bytes()
    high_cap = max(24 << 20, min(100 << 20, (vmem_cap * 7) // 10))
    tb = _pick_tb(bc, per_step_vmem, budget_bytes=high_cap - (8 << 20))
    steps = _cdiv(bc, tb)
    vmem_limit = int(min(max(per_step_vmem(tb) + (6 << 20), 32 << 20), high_cap))

    xf = x.reshape(bc, H, W)
    kern = functools.partial(_maxblurpool_kernel, pool=pool, tb=tb,
                             hm=hm, wm=wm, compute_dtype=compute_dtype)

    cost = pl.CostEstimate(
        flops=2 * bc * (hm * wm * ow + oh * hm * ow),
        transcendentals=0,
        bytes_accessed=bc * (H * W + oh * ow) * isz + (oh * hm + wm * ow) * csz,
    )

    out = pl.pallas_call(
        kern,
        out_shape=jax.ShapeDtypeStruct((bc, oh, ow), x.dtype),
        grid=(steps,),
        in_specs=[
            pl.BlockSpec((tb, H, W), lambda i: (i, 0, 0)),
            pl.BlockSpec((oh, hm), lambda i: (0, 0)),
            pl.BlockSpec((wm, ow), lambda i: (0, 0)),
        ],
        out_specs=pl.BlockSpec((tb, oh, ow), lambda i: (i, 0, 0)),
        compiler_params=pltpu.CompilerParams(
            dimension_semantics=("parallel",),
            vmem_limit_bytes=vmem_limit,
        ),
        cost_estimate=cost,
    )(xf, jnp.asarray(r_mat, compute_dtype), jnp.asarray(ct_mat, compute_dtype))

    return out.reshape(B, C, oh, ow)


# ------------------------------ pure-JAX reference ---------------------------
def _ref_max_blur_pool_2d(x, kernel_size=3, stride=2, max_pool_size=2):
    B, C, H, W = x.shape
    mp = lax.reduce_window(x, -jnp.inf, lax.max,
                           (1, 1, max_pool_size, max_pool_size),
                           (1, 1, 1, 1), "VALID")
    pad = (kernel_size - 1) // 2
    k2 = jnp.asarray(_pascal_kernel_2d(kernel_size), x.dtype)
    w = jnp.broadcast_to(k2, (C, 1, kernel_size, kernel_size))
    return lax.conv_general_dilated(
        mp, w, (stride, stride), [(pad, pad), (pad, pad)],
        feature_group_count=C, dimension_numbers=("NCHW", "OIHW", "NCHW"))


if __name__ == "__main__":
    key = jax.random.PRNGKey(0)
    x = jax.random.normal(key, (2, 4, 16, 16), dtype=jnp.float32)

    y = max_blur_pool_2d(x, kernel_size=3, stride=2, max_pool_size=2, ceil_mode=False)
    y = jax.block_until_ready(y)
    y_ref = _ref_max_blur_pool_2d(x, kernel_size=3, stride=2, max_pool_size=2)
    assert y.shape == (2, 4, 8, 8), y.shape
    assert np.allclose(np.asarray(y), np.asarray(y_ref), atol=1e-5, rtol=1e-5)

    # Odd plane count (exercises the cdiv / ragged-last-block path) + larger blur.
    x2 = jax.random.normal(jax.random.PRNGKey(1), (1, 3, 24, 24), dtype=jnp.float32)
    y2 = jax.block_until_ready(
        max_blur_pool_2d(x2, kernel_size=5, stride=2, max_pool_size=2))
    y2_ref = _ref_max_blur_pool_2d(x2, kernel_size=5, stride=2, max_pool_size=2)
    assert np.allclose(np.asarray(y2), np.asarray(y2_ref), atol=1e-5, rtol=1e-5)

    # bf16 path (intermediate cast back to bf16 keeps the fast MXU path).
    xb = x.astype(jnp.bfloat16)
    yb = jax.block_until_ready(
        max_blur_pool_2d(xb, kernel_size=3, stride=2, max_pool_size=2))
    assert yb.dtype == jnp.bfloat16
    assert np.allclose(np.asarray(yb).astype(np.float32), np.asarray(y_ref),
                       atol=1e-1, rtol=1e-1)

    print("KERNEL_OK")
</pallas_src>

<mosaic_0001>
module attributes {stable_mosaic.version = 11 : i64} {
  func.func @_maxblurpool_kernel(%arg0: i32, %arg1: memref<4x16x16xf32, #tpu.memory_space<vmem>>, %arg2: memref<8x15xf32, #tpu.memory_space<vmem>>, %arg3: memref<15x8xf32, #tpu.memory_space<vmem>>, %arg4: memref<4x8x8xf32, #tpu.memory_space<vmem>>) attributes {dimension_semantics = [#tpu.dimension_semantics<parallel>], iteration_bounds = array<i64: 2>, scalar_prefetch = 0 : i64, scratch_operands = 0 : i64, tpu.core_type = #tpu.core_type<tc>, window_params = [{transform_indices = @transform_0, window_bounds = array<i64: 4, 16, 16>}, {pipeline_mode = #tpu.pipeline_mode<synchronous>, transform_indices = @transform_1, window_bounds = array<i64: 8, 15>}, {pipeline_mode = #tpu.pipeline_mode<synchronous>, transform_indices = @transform_2, window_bounds = array<i64: 15, 8>}, {transform_indices = @transform_3, window_bounds = array<i64: 4, 8, 8>}]} {
    %c0 = arith.constant 0 : index
    %c0_0 = arith.constant 0 : index
    %c0_1 = arith.constant 0 : index
    %0 = vector.load %arg1[%c0, %c0_0, %c0_1] : memref<4x16x16xf32, #tpu.memory_space<vmem>>, vector<4x16x16xf32>
    %1 = vector.extract_strided_slice %0 {offsets = [0, 0, 0], sizes = [4, 15, 15], strides = [1, 1, 1]} : vector<4x16x16xf32> to vector<4x15x15xf32>
    %2 = vector.extract_strided_slice %0 {offsets = [0, 0, 1], sizes = [4, 15, 15], strides = [1, 1, 1]} : vector<4x16x16xf32> to vector<4x15x15xf32>
    %3 = arith.maximumf %1, %2 : vector<4x15x15xf32>
    %4 = vector.extract_strided_slice %0 {offsets = [0, 1, 0], sizes = [4, 15, 15], strides = [1, 1, 1]} : vector<4x16x16xf32> to vector<4x15x15xf32>
    %5 = vector.extract_strided_slice %0 {offsets = [0, 1, 1], sizes = [4, 15, 15], strides = [1, 1, 1]} : vector<4x16x16xf32> to vector<4x15x15xf32>
    %6 = arith.maximumf %4, %5 : vector<4x15x15xf32>
    %7 = arith.maximumf %3, %6 : vector<4x15x15xf32>
    %c0_2 = arith.constant 0 : index
    %c0_3 = arith.constant 0 : index
    %8 = vector.load %arg3[%c0_2, %c0_3] : memref<15x8xf32, #tpu.memory_space<vmem>>, vector<15x8xf32>
    %9 = vector.shape_cast %8 : vector<15x8xf32> to vector<1x15x8xf32>
    %10 = vector.broadcast %9 : vector<1x15x8xf32> to vector<4x15x8xf32>
    %cst = arith.constant dense<0.000000e+00> : vector<4x15x8xf32>
    %11 = tpu.matmul %7, %10, %cst {dimension_numbers = #tpu.dot_dimension_numbers<[2], [1], [1], [2], [0, 0, 0, 1, 1, 2], [0], [0]>} : vector<4x15x15xf32>, vector<4x15x8xf32>, vector<4x15x8xf32> -> vector<4x15x8xf32>
    %c0_4 = arith.constant 0 : index
    %c0_5 = arith.constant 0 : index
    %12 = vector.load %arg2[%c0_4, %c0_5] : memref<8x15xf32, #tpu.memory_space<vmem>>, vector<8x15xf32>
    %13 = vector.shape_cast %12 : vector<8x15xf32> to vector<1x8x15xf32>
    %14 = vector.broadcast %13 : vector<1x8x15xf32> to vector<4x8x15xf32>
    %cst_6 = arith.constant dense<0.000000e+00> : vector<4x8x8xf32>
    %15 = tpu.matmul %14, %11, %cst_6 {dimension_numbers = #tpu.dot_dimension_numbers<[2], [1], [1], [2], [0, 0, 0, 1, 1, 2], [0], [0]>} : vector<4x8x15xf32>, vector<4x15x8xf32>, vector<4x8x8xf32> -> vector<4x8x8xf32>
    %c0_7 = arith.constant 0 : index
    %c0_8 = arith.constant 0 : index
    %c0_9 = arith.constant 0 : index
    %16 = vector.load %arg4[%c0_7, %c0_8, %c0_9] : memref<4x8x8xf32, #tpu.memory_space<vmem>>, vector<4x8x8xf32>
    tpu.vector_store %arg4[%c0_7, %c0_8, %c0_9], %15 {strides = array<i32>} : memref<4x8x8xf32, #tpu.memory_space<vmem>>, vector<4x8x8xf32>,
    return
  }
  func.func @transform_0(%arg0: i32) -> (i32, i32, i32) {
    %c0_i32 = arith.constant 0 : i32
    %c0_i32_0 = arith.constant 0 : i32
    %c0_i32_1 = arith.constant 0 : i32
    return %arg0, %c0_i32, %c0_i32_0 : i32, i32, i32
  }
  func.func @transform_1(%arg0: i32) -> (i32, i32) {
    %c0_i32 = arith.constant 0 : i32
    %c0_i32_0 = arith.constant 0 : i32
    %c0_i32_1 = arith.constant 0 : i32
    return %c0_i32, %c0_i32_0 : i32, i32
  }
  func.func @transform_2(%arg0: i32) -> (i32, i32) {
    %c0_i32 = arith.constant 0 : i32
    %c0_i32_0 = arith.constant 0 : i32
    %c0_i32_1 = arith.constant 0 : i32
    return %c0_i32, %c0_i32_0 : i32, i32
  }
  func.func @transform_3(%arg0: i32) -> (i32, i32, i32) {
    %c0_i32 = arith.constant 0 : i32
    %c0_i32_0 = arith.constant 0 : i32
    %c0_i32_1 = arith.constant 0 : i32
    return %arg0, %c0_i32, %c0_i32_0 : i32, i32, i32
  }
}

</mosaic_0001>

<bundles_post_ra>
// kernel: tpu_custom_call.1
= control target key start
LH: loop header
LB: loop body
LE: loop exit
PB: predicated region body
PF: predicated region fallthrough
CT: control target
= control target key end

     0   :  { %8 = vsyncpa [#allocation3], 0  ;;  %s1566_s0 = inlined_call_operand.hbm [shape: f32[8,16,16], index: 0, kind: input, shape index: {}]   ;;  %s1567_s1 = inlined_call_operand.vmem [shape: f32[8,15], index: 1, kind: input, shape index: {}]   ;;  %s1568_s2 = inlined_call_operand.vmem [shape: f32[15,8], index: 2, kind: input, shape index: {}]   ;;  %s1569_s3 = inlined_call_operand.hbm [shape: f32[8,8,8], index: 3, kind: output, shape index: {}]  }
   0x1   :  { %10 = vsyncpa [#allocation3 + $0x1], 0 }
   0x2   :  { %11 = vsyncpa [#allocation4], 0 }
   0x3   :  { %13 = vsyncpa [#allocation4 + $0x1], 0  ;;  %s1341_s12 = smov 0   ;;  %s1343_s13 = smov 0  }
   0x4   :  { %s1345_s14 = smov 0   ;;  %s1347_s15 = smov 0  }
   0x5 LB: > { %s1362_s16 = sadd.s32 4294967295, %s1308_s15   ;;  %s995_s17 = sadd.s32 4294967294, %s1308_s15   ;;  %s1308_s15 = sphi %s1347_s15, %s1584_s15   ;;  %s1304_s14 = sphi %s1345_s14, %s1583_s14   ;;  %s1300_s13 = sphi %s1343_s13, %s1582_s13   ;;  %s1296_s12 = sphi %s1341_s12, %s1581_s12  }
   0x6   : > { %s1366_s18 = sadd.s32 1, %s1308_s15   ;;  %s26_s19 = sadd.s32 1, %s1304_s14 }
   0x7   : > { %s23_s20 = ssub.s32 %s1308_s15, %s1366_s18  ;;  %p33_p0 = scmp.ne.s32.totalorder %s1304_s14, %s1300_s13 }
   0x8   : > { %p24_p1 = scmp.eq.s32.totalorder %s23_s20, 0  ;;  %p34_p2 = scmp.eq.s32.totalorder %s1308_s15, 0 }
   0x9   : > { %p39_p3 = scmp.ne.s32.totalorder %s1300_s13, %s1296_s12  ;;  %p40_p4 = scmp.eq.s32.totalorder %s1362_s16, 0 }
   0xa   : > { %s1378_s21 = scalar_select %p24_p1, %s1304_s14, %s26_s19  }
   0xb   : > { %p1380_p5 = por %p34_p2, %p33_p0  ;;  %p1384_p6 = por %p40_p4, %p39_p3 }
   0xc   : > { %p105_p7 = scmp.eq.s32.totalorder %s1362_s16, 1  ;;  %p111_p8 = scmp.eq.s32.totalorder %s995_s17, 1 }
   0xd   : > { %p1169_p10 = scmp.lt.s32.totalorder %s1308_s15, 2  ;;  %s137_s26 = sand.u32 1, %s1304_s14  }
   0xe   : > { %p1391_p11 = por %p105_p7, %p33_p0  ;;  %p1395_p12 = por %p111_p8, %p39_p3 }
   0xf   : > { %s1031_s27 = sshll.u32 %s1308_s15, 10  ;;  %s998_s28 = sshll.u32 %s137_s26, 6 }
  0x10   : > { %s1573_s24 = scalar_select %p1391_p11, 1, 0 }
  0x11   : > { %s1574_s25 = scalar_select %p1395_p12, 1, 0 }
  0x12   : > { %s1404_s4 = scalar_lea.hbm %s1566_s0, %s1031_s27  ;;  %s141_s5 = scalar_lea.vmem [#allocation2], %s998_s28 }
  0x13   : > { %s149_s6 = sshll.u32 %s141_s5, 4  ;;  %p1408_p13 = pnand %p1169_p10, %p1380_p5  ;;  %s1412_s6 = int_to_ptr.vmem [resolvable:$true] %s149_s6 }
  0x14   : > { %s1414_s8 = scalar_lea.sflag [#allocation3], %s137_s26  ;;  %s1212_s9 = scalar_lea.hbm %s1404_s4, 1024 }
  0x15   : > { %p1213_p0 = scmp.ne.s32.totalorder %s1404_s4, %s1212_s9  ;;  %p1214_p1 = pneg %p1408_p13 }
  0x16   : > { %s1217_s17 = scalar_lea.hbm %s1566_s0, 2048  ;;  %p1218_p4 = scmp.lt.u32.totalorder %s1404_s4, %s1566_s0 }
  0x17   : > { %p1215_p2 = pnand %p1214_p1, %p1213_p0  ;;  %p1219_p5 = scmp.lt.u32.totalorder %s1217_s17, %s1212_s9 }
  0x18   : > { %p1221_p8 = scmp.lt.u32.totalorder %s1212_s9, %s1404_s4 }
  0x19   : > { %p1216_p3 = pneg %p1215_p2  ;;  %p1220_p7 = por %p1219_p5, %p1218_p4 }
  0x1b   : > { %p1222_p10 = por %p1221_p8, %p1220_p7 }
  0x1d   : > { %p1223_p9 = pnand %p1222_p10, %p1216_p3 }
  0x1f   : > { %1226 = shalt.err (!%p1223_p9)
}
  0x20   : > { %s1227_s22 = scalar_lea.vmem %s1412_s6, 1024  ;;  %s1310_s26 = smov [#allocation2]  }
  0x21   : > { %p1228_p0 = scmp.ne.s32.totalorder %s1412_s6, %s1227_s22  ;;  %s1232_s27 = sshll.u32 %s1310_s26, 4  ;;  %s1233_s27 = int_to_ptr.vmem [resolvable:$false] %s1232_s27 }
  0x22   : > { %s1234_s28 = scalar_lea.vmem %s1233_s27, 2048  ;;  %p1235_p11 = scmp.lt.s32.totalorder %s1412_s6, %s1233_s27 }
  0x23   : > { %p1230_p2 = pnand %p1228_p0, %p1214_p1  ;;  %p1236_p4 = scmp.lt.s32.totalorder %s1234_s28, %s1227_s22 }
  0x25   : > { %p1231_p12 = pneg %p1230_p2  ;;  %p1237_p5 = por %p1236_p4, %p1235_p11 }
  0x27   : > { %p1238_p7 = pnand %p1237_p5, %p1231_p12 }
  0x29   : > { %1241 = shalt.err (!%p1238_p7)
}
  0x2a   : > { %s1311_s29 = smov 128   ;;  %s1312_s30 = smov 8  }
  0x2b   : > { %1164 = dma.hbm_to_vmem [thread:$0]  (!%p1408_p13), %s1404_s4, 1024, %s1412_s6, %s1414_s8, %s1311_s29, %s1311_s29, %s1312_s30  }
  0x2c   : > { %p1002_p9 = scmp.ge.s32.totalorder %s1308_s15, 1  ;;  %p157_p1 = scmp.lt.s32.totalorder %s1308_s15, 3 }
  0x2e   : > { %p158_p3 = pnand %p1002_p9, %p157_p1 }
  0x2f   : > { %s1445_s5 = sand.u32 (!%p158_p3), 1, %s1300_s13  }
  0x30   : > { %161 = sbr.rel (%p158_p3) target bundleno = 637 (0x27d), region = 32  ;;  %s1003_s9 = sshll.u32 (!%p158_p3), %s1445_s5, 6 }
  0x31   : > { %s164_s10 = scalar_lea.sflag (!%p158_p3), [#allocation3], %s1445_s5  ;;  %s167_s11 = scalar_lea.vmem (!%p158_p3), [#allocation2], %s1003_s9 }
  0x37   : > { %1287 = dma.done.wait (%p1384_p6), %s164_s10, 1024  }
  0x38   : > { %1289 = vsyncadd (%p1384_p6), %s164_s10, 4294966272  ;;  %v194_v0 = vld [vmem:[%s167_s11 + $0x10] sm:$0xff]  ;;  %v192_v1 = vld [vmem:[%s167_s11] sm:$0xff]  ;;  %vm248_vm0 = vcmask 1046528   ;;  %s1313_s4 = smov 127   ;;  %vm1314_vm1 = vmmov 1  }
  0x39   : > { %212 = vrot.lane.b32.xlu1 %v194_v0, %s1313_s4  ;;  %208 = vrot.lane.b32.xlu0 %v192_v1, %s1313_s4  ;;  %v195_v2 = vld [vmem:[%s167_s11 + $0x18] sm:$0xff]  ;;  %v193_v3 = vld [vmem:[%s167_s11 + $0x8] sm:$0xff]  ;;  %vm1454_vm2 = vmpackc.low %vm248_vm0, %vm1314_vm1  ;;  %vm279_vm3 = vcmask 121856   ;;  %v1315_v48 = vmov 0.0|0.0   ;;  %vm1316_vm4 = vmmov 0   ;;  %v1317_v49 = vmov 0.0  }
  0x3a   : > { %v277_v5 = vld [vmem:[%s1568_s2] sm:$0xff]  ;;  %v278_v6 = vld [vmem:[%s1568_s2 + $0x8] sm:$0x7f]  ;;  %v199_v10 = vld [vmem:[%s167_s11 + $0x38] sm:$0xff]  ;;  %s1004_s20 = sshll.u32 %s1445_s5, 5  ;;  %vm903_vm5 = vcmask 64512  }
  0x3b   : > { %v1117_v7 = vpack.c.bf16 %v278_v6, %v277_v5  ;;  %v197_v8 = vld [vmem:[%s167_s11 + $0x28] sm:$0xff]  ;;  %v196_v9 = vld [vmem:[%s167_s11 + $0x20] sm:$0xff]  ;;  %v198_v11 = vld [vmem:[%s167_s11 + $0x30] sm:$0xff]  ;;  %s189_s22 = scalar_lea.vmem [#allocation5], %s1004_s20  ;;  %s1032_s27 = sshll.u32 %s1362_s16, 9 }
  0x3c   : > { %v607_v57 = vld [vmem:[%s1567_s1] sm:$0xff]  ;;  %s922_s26 = sshll.u32 %s189_s22, 4  ;;  %s1521_s30 = scalar_lea.hbm %s1569_s3, %s1032_s27  ;;  %s1515_s26 = int_to_ptr.vmem [resolvable:$true] %s922_s26 }
  0x3d   : > { %214 = vrot.lane.b32.xlu1 %v195_v2, %s1313_s4  ;;  %210 = vrot.lane.b32.xlu0 %v193_v3, %s1313_s4  ;;  %s909_s9 = scalar_lea.sflag [#allocation4], %s1445_s5  ;;  %s1242_s16 = scalar_lea.vmem %s1515_s26, 512 }
  0x3e   : > { %1119 = vmatprep.subr.msk.bf16.mxu0 %vm1454_vm2, %v1117_v7  ;;  %1125 = vmatprep.subr.msk.bf16.mxu1 %vm1454_vm2, %v1117_v7  ;;  %p1243_p6 = scmp.ne.s32.totalorder %s1515_s26, %s1242_s16  ;;  %p1578_p11 = scmp.ne.s32.totalorder %s1573_s24, 0 }
  0x3f   : > { %1122 = vmatpush3.bf16.msk.msra.mxu0 %vm1454_vm2, %v1117_v7  ;;  %1128 = vmatpush3.bf16.msk.msra.mxu1 %vm1454_vm2, %v1117_v7  ;;  %s1318_s10 = smov [#allocation5]  }
  0x40   : > { %1131 = vmatprep.subr.msk.bf16.mxu0 %vm1454_vm2, %v1117_v7  ;;  %1137 = vmatprep.subr.msk.bf16.mxu1 %vm1454_vm2, %v1117_v7  ;;  %p1244_p12 = pnand %p1243_p6, %p1578_p11  ;;  %s1246_s11 = sshll.u32 %s1318_s10, 4  ;;  %s1247_s11 = int_to_ptr.vmem [resolvable:$false] %s1246_s11 }
  0x41   : > { %218 = vrot.lane.b32.xlu1 %v197_v8, %s1313_s4  ;;  %216 = vrot.lane.b32.xlu0 %v196_v9, %s1313_s4  ;;  %p1249_p8 = scmp.lt.s32.totalorder %s1515_s26, %s1247_s11 }
  0x42   : > { %p1245_p13 = pneg %p1244_p12 }
  0x45   : > { %222 = vrot.lane.b32.xlu1 %v199_v10, %s1313_s4  ;;  %220 = vrot.lane.b32.xlu0 %v198_v11, %s1313_s4  ;;  %s1248_s4 = scalar_lea.vmem %s1247_s11, 1024 }
  0x46   : > { %p1250_p10 = scmp.lt.s32.totalorder %s1248_s4, %s1242_s16 }
  0x48   : > { %p1251_p0 = por %p1250_p10, %p1249_p8 }
  0x4a   : > { %p1252_p2 = pnand %p1251_p0, %p1245_p13 }
  0xab   : > { %v213_v12 = vpop.permute.xlu1 %212  ;;  %v209_v13 = vpop.permute.xlu0 %208 }
  0xac   : > { %v234_v14 = vmax.f32 %v194_v0, %v213_v12  ;;  %v232_v15 = vmax.f32 %v192_v1, %v209_v13 }
  0xae   : > { %v252_v22 = vrot.slane %v234_v14, 1  ;;  %v249_v23 = vrot.slane %v232_v15, 1 }
  0xaf   : > { %v215_v16 = vpop.permute.xlu1 %214  ;;  %v211_v17 = vpop.permute.xlu0 %210 }
  0xb0   : > { %v235_v18 = vmax.f32 %v195_v2, %v215_v16  ;;  %v233_v19 = vmax.f32 %v193_v3, %v211_v17 }
  0xb2   : > { %v253_v20 = vrot.slane %v235_v18, 1  ;;  %v250_v21 = vrot.slane %v233_v19, 1 }
  0xb3   : > { %v219_v24 = vpop.permute.xlu1 %218  ;;  %v217_v25 = vpop.permute.xlu0 %216 }
  0xb4   : > { %v237_v26 = vmax.f32 %v197_v8, %v219_v24  ;;  %v236_v27 = vmax.f32 %v196_v9, %v217_v25  ;;  %v254_v28 = vsel %vm248_vm0, %v252_v22, %v253_v20  ;;  %v251_v29 = vsel %vm248_vm0, %v249_v23, %v250_v21 }
  0xb5   : > { %v271_v32 = vmax.f32 %v234_v14, %v254_v28  ;;  %v269_v33 = vmax.f32 %v232_v15, %v251_v29  ;;  %v272_v34 = vmax.f32 %v235_v18, %v253_v20  ;;  %v270_v35 = vmax.f32 %v233_v19, %v250_v21 }
  0xb6   : > { %v256_v30 = vrot.slane %v237_v26, 1  ;;  %v255_v31 = vrot.slane %v236_v27, 1 }
  0xb7   : > { %v223_v36 = vpop.permute.xlu1 %222  ;;  %v221_v37 = vpop.permute.xlu0 %220  ;;  %1072 = vmatprep.mubr.msk.f32.mxu1 %vm279_vm3, %v271_v32  ;;  %1065 = vmatprep.mubr.msk.f32.mxu0 %vm279_vm3, %v269_v33 }
  0xb8   : > { %v257_v38 = vsel %vm248_vm0, %v255_v31, %v256_v30  ;;  %v239_v39 = vmax.f32 %v199_v10, %v223_v36  ;;  %v238_v41 = vmax.f32 %v198_v11, %v221_v37  ;;  %1066 = vmatmul.mubr.msk.f32.vlgmr.msra.gmra.mrb[0].mxu0 %vm279_vm3, %v270_v35  ;;  %1073 = vmatmul.mubr.msk.f32.vlgmr.msra.gmra.mrb[0].mxu1 %vm279_vm3, %v272_v34 }
  0xb9   : > { %v273_v40 = vmax.f32 %v236_v27, %v257_v38  ;;  %1134 = vmatpush3.bf16.msk.msra.mxu0 %vm1454_vm2, %v1117_v7  ;;  %1140 = vmatpush3.bf16.msk.msra.mxu1 %vm1454_vm2, %v1117_v7  ;;  %v274_v43 = vmax.f32 %v237_v26, %v256_v30 }
  0xba   : > { %v259_v42 = vrot.slane %v239_v39, 1  ;;  %v258_v44 = vrot.slane %v238_v41, 1  ;;  %1141 = vmatprep.subr.bf16.mxu0 %v1315_v48  ;;  %1145 = vmatprep.subr.bf16.mxu1 %v1315_v48 }
  0xbb   : > { %1079 = vmatprep.mubr.msk.f32.mxu0 %vm279_vm3, %v273_v40 }
  0xbc   : > { %v260_v45 = vsel %vm248_vm0, %v258_v44, %v259_v42  ;;  %1080 = vmatmul.mubr.msk.f32.vlgmr.msra.gmra.mrb[2].mxu0 %vm279_vm3, %v274_v43  ;;  %v276_v47 = vmax.f32 %v239_v39, %v259_v42 }
  0xbd   : > { %v275_v46 = vmax.f32 %v238_v41, %v260_v45  ;;  %1093 = vmatprep.mubr.msk.f32.mxu0 %vm1316_vm4, %v1317_v49 }
  0xbf   : > { %1086 = vmatprep.mubr.msk.f32.mxu1 %vm279_vm3, %v275_v46 }
  0xc0   : > { %1087 = vmatmul.mubr.msk.f32.vlgmr.msra.gmra.mrb[2].mxu1 %vm279_vm3, %v276_v47 }
  0xc1   : > { %1100 = vmatprep.mubr.msk.f32.mxu1 %vm1316_vm4, %v1317_v49 }
 0x18b   : > { %v1067_v50 = vpop.f32.mrb[0].mxu0  ;;  %v1074_v51 = vpop.f32.mrb[0].mxu1 }
 0x18c   : > { %v355_v52 = vpop.f32.mrb[1].mxu0  ;;  %v436_v53 = vpop.f32.mrb[1].mxu1 }
 0x18d   : > { %v1142_v54 = vpack.c.bf16 %v1067_v50, %v355_v52  ;;  %v1146_v55 = vpack.c.bf16 %v1074_v51, %v436_v53 }
 0x18f   : > { %v1081_v56 = vpop.f32.mrb[2].mxu0  ;;  %1144 = vmatpush3.bf16.msk.msra.mxu0 %vm1454_vm2, %v1142_v54  ;;  %1148 = vmatpush3.bf16.msk.msra.mxu1 %vm1454_vm2, %v1146_v55 }
 0x190   : > { %v517_v58 = vpop.f32.mrb[3].mxu0  ;;  %1149 = vmatprep.subr.bf16.mxu0 %v1315_v48  ;;  %1153 = vmatprep.subr.bf16.mxu1 %v1315_v48 }
 0x191   : > { %v1150_v59 = vpack.c.bf16 %v1081_v56, %v517_v58 }
 0x192   : > { %1094 = vmatmul.mubr.msk.f32.vlgmr.msra.gmra.mrb[4].mxu0 %vm279_vm3, %v607_v57  ;;  %1101 = vmatmul.mubr.msk.f32.vlgmr.msra.gmra.mrb[4].mxu1 %vm279_vm3, %v607_v57 }
 0x193   : > { %v1088_v60 = vpop.f32.mrb[2].mxu1  ;;  %1152 = vmatpush3.bf16.msk.msra.mxu0 %vm1454_vm2, %v1150_v59  ;;  %1107 = vmatprep.mubr.msk.f32.mxu0 %vm1316_vm4, %v1317_v49 }
 0x194   : > { %v598_v61 = vpop.f32.mrb[3].mxu1  ;;  %1114 = vmatprep.mubr.msk.f32.mxu1 %vm1316_vm4, %v1317_v49 }
 0x195   : > { %v1154_v62 = vpack.c.bf16 %v1088_v60, %v598_v61 }
 0x196   : > { %1108 = vmatmul.mubr.msk.f32.vlgmr.msra.gmra.mrb[6].mxu0 %vm279_vm3, %v607_v57 }
 0x197   : > { %1156 = vmatpush3.bf16.msk.msra.mxu1 %vm1454_vm2, %v1154_v62 }
 0x19a   : > { %1115 = vmatmul.mubr.msk.f32.vlgmr.msra.gmra.mrb[6].mxu1 %vm279_vm3, %v607_v57 }
 0x265   : > { %v680_v63 = vpop.f32.mrb[4].mxu0  ;;  %v753_v0 = vpop.f32.mrb[4].mxu1 }
 0x266   : > { %904 = vst.msk [vmem:[%s189_s22] sm:$0xff] %vm903_vm5, %v680_v63  ;;  %905 = vst.msk [vmem:[%s189_s22 + $0x8] sm:$0xff] %vm903_vm5, %v753_v0  ;;  %v1095_v1 = vpop.f32.mrb[5].mxu0  ;;  %v1102_v2 = vpop.f32.mrb[5].mxu1 }
 0x269   : > { %v826_v3 = vpop.f32.mrb[6].mxu0 }
 0x26a   : > { %906 = vst.msk [vmem:[%s189_s22 + $0x10] sm:$0xff] %vm903_vm5, %v826_v3  ;;  %v1109_v4 = vpop.f32.mrb[7].mxu0 }
 0x26d   : > { %v899_v5 = vpop.f32.mrb[6].mxu1 }
 0x26e   : > { %907 = vst.msk [vmem:[%s189_s22 + $0x18] sm:$0xff] %vm903_vm5, %v899_v5  ;;  %v1116_v6 = vpop.f32.mrb[7].mxu1 }
 0x26f   : > { %1255 = shalt.err (!%p1252_p2)
}
 0x270   : > { %s1256_s6 = scalar_lea.hbm %s1521_s30, 512  ;;  %s1260_s8 = scalar_lea.hbm %s1569_s3, 1024 }
 0x271   : > { %p1257_p4 = scmp.ne.s32.totalorder %s1521_s30, %s1256_s6  ;;  %p1261_p9 = scmp.lt.u32.totalorder %s1521_s30, %s1569_s3 }
 0x272   : > { %p1262_p1 = scmp.lt.u32.totalorder %s1260_s8, %s1256_s6  ;;  %p1264_p6 = scmp.lt.u32.totalorder %s1256_s6, %s1521_s30 }
 0x273   : > { %p1258_p5 = pnand %p1257_p4, %p1578_p11 }
 0x274   : > { %p1263_p3 = por %p1262_p1, %p1261_p9 }
 0x275   : > { %p1259_p7 = pneg %p1258_p5 }
 0x276   : > { %p1265_p12 = por %p1264_p6, %p1263_p3 }
 0x278   : > { %p1266_p13 = pnand %p1265_p12, %p1259_p7 }
 0x27a   : > { %1269 = shalt.err (!%p1266_p13)
}
 0x27b   : > { %s1319_s20 = smov 128   ;;  %s1320_s22 = smov 8  }
 0x27c   : > { %1159 = dma.vmem_to_hbm [thread:$0]  (%p1578_p11), %s1515_s26, 512, %s1521_s30, %s909_s9, %s1319_s20, %s1319_s20, %s1320_s22  }
 0x27d PF: > { %s937_s27 = sand.u32 1, %s1296_s12   ;;  %p1579_p8 = scmp.ne.s32.totalorder %s1574_s25, 0 }
 0x27e   : > { %p1580_p10 = scmp.ge.s32.totalorder %s1308_s15, 2  ;;  %s938_s28 = scalar_lea.sflag [#allocation4], %s937_s27 }
 0x280   : > { %p1166_p0 = pnand %p1580_p10, %p1579_p8 }
 0x282   : > { %1291 = dma.done.wait (!%p1166_p0), %s938_s28, 512  }
 0x283   : > { %1293 = vsyncadd (!%p1166_p0), %s938_s28, 4294966784  ;;  %p16_p2 = scmp.ge.s32.totalorder %s1366_s18, 4   ;;  %s1581_s12 = smov %s1300_s13 }
 0x284   : > { %s1582_s13 = smov %s1304_s14  ;;  %s1583_s14 = smov %s1378_s21 }
 0x285   : > { %s1584_s15 = smov %s1366_s18  ;;  %18 = sbr.rel (!%p16_p2) target bundleno = 5 (0x5), region = 77 }
 0x28c   :  { %943 = vsyncpa [#allocation3], 1 }
 0x28d   :  { %945 = vsyncpa [#allocation3 + $0x1], 1 }
 0x28e   :  { %946 = vsyncpa [#allocation4], 1 }
 0x28f   :  { %948 = vsyncpa [#allocation4 + $0x1], 1 }

</bundles_post_ra>
